<compile_context>
chip_gen: v7x
topology: tpu7x:2x2x1
jax: 0.10.0
libtpu: 0.0.40
codegen_flags: <defaults>
</compile_context>

<pallas_src>
import functools

import jax
import jax.numpy as jnp
from jax.experimental import pallas as pl
from jax.experimental.pallas import tpu as pltpu

LINEAR_TM = 256          # rows per linear tile (>=128 for v5e, fills MXU on v6e/v7x)
ATTN_TQ = 512            # query rows per attention tile
ATTN_TK = 512            # key rows per attention tile (flash-style reduction axis)
VMEM_LIMIT_BYTES = 32 * 1024 * 1024   # explicit scoped-VMEM budget (safe on v5e/v6e/v7x)


# ---------------------------------------------------------------------------
# Tiled linear (x @ W + b) kernel — W_queries/W_keys/W_values (fused) and W_out
# ---------------------------------------------------------------------------
def _linear_kernel(x_ref, w_ref, b_ref, o_ref):
    # bf16 operands directly on the MXU, f32 accumulate; bias add in f32.
    acc = jnp.dot(x_ref[...], w_ref[...], preferred_element_type=jnp.float32)
    o_ref[...] = (acc + b_ref[...].astype(jnp.float32)).astype(o_ref.dtype)


def pallas_linear(x2d, w, b, *, tm=LINEAR_TM):
    """x2d: (M, Din) bf16, w: (Din, Dout) bf16, b: (Dout,) bf16 -> (M, Dout) bf16."""
    M, Din = x2d.shape
    Dout = w.shape[1]
    tm = min(tm, M)
    grid = (pl.cdiv(M, tm),)
    return pl.pallas_call(
        _linear_kernel,
        out_shape=jax.ShapeDtypeStruct((M, Dout), x2d.dtype),
        grid=grid,
        in_specs=[
            pl.BlockSpec((tm, Din), lambda i: (i, 0)),
            pl.BlockSpec((Din, Dout), lambda i: (0, 0)),
            pl.BlockSpec((1, Dout), lambda i: (0, 0)),
        ],
        out_specs=pl.BlockSpec((tm, Dout), lambda i: (i, 0)),
        compiler_params=pltpu.CompilerParams(
            dimension_semantics=("parallel",),
            vmem_limit_bytes=VMEM_LIMIT_BYTES,
        ),
    )(x2d, w, b.reshape(1, Dout))


# ---------------------------------------------------------------------------
# Multi-head attention kernel: lane-dense (B, N, D) in/out, per-head slabs
# inside, flash-style online softmax over key tiles.
# ---------------------------------------------------------------------------
def _mha_kernel(q_ref, k_ref, v_ref, mask_ref, o_ref, m_sc, l_sc, acc_sc, *, n_heads):
    kv = pl.program_id(2)
    last_kv = pl.num_programs(2) - 1

    @pl.when(kv == 0)
    def _init():
        m_sc[...] = jnp.full_like(m_sc, -jnp.inf)
        l_sc[...] = jnp.zeros_like(l_sc)
        acc_sc[...] = jnp.zeros_like(acc_sc)

    q = q_ref[0]          # (TQ, D)  bf16
    k = k_ref[0]          # (TK, D)  bf16
    v = v_ref[0]          # (TK, D)  bf16
    mask = mask_ref[0]    # (TQ, TK) f32, 1=keep / 0=masked
    masked_out = mask == 0.0

    tq, D = q.shape
    dh = D // n_heads
    # fold 1/sqrt(dim_value) into q: O(TQ*D) VALU instead of O(TQ*TK)
    q = q * jnp.asarray(1.0 / (dh ** 0.5), dtype=q.dtype)

    for h in range(n_heads):  # static unroll; all heads reuse one k/v/mask DMA
        sl = slice(h * dh, (h + 1) * dh)
        # coefficients = Q_h K_h^T / sqrt(dim_value)   (bf16 in, f32 MXU accumulate)
        s = jnp.dot(q[:, sl], k[:, sl].T, preferred_element_type=jnp.float32)
        # masked_fill(mask == False, -10000.0)
        s = jnp.where(masked_out, jnp.float32(-10000.0), s)

        m_prev = m_sc[h]                                            # (TQ, 1)
        m_new = jnp.maximum(m_prev, jnp.max(s, axis=-1, keepdims=True))
        alpha = jnp.exp(m_prev - m_new)
        p = jnp.exp(s - m_new)                                      # (TQ, TK) f32
        l_sc[h] = alpha * l_sc[h] + jnp.sum(p, axis=-1, keepdims=True)
        acc_sc[h] = alpha * acc_sc[h] + jnp.dot(
            p.astype(v.dtype), v[:, sl], preferred_element_type=jnp.float32)
        m_sc[h] = m_new

    @pl.when(kv == last_kv)
    def _finalize():
        for h in range(n_heads):
            att = acc_sc[h] * pl.reciprocal(l_sc[h], approx=True)   # (TQ, dh) f32
            o_ref[0, :, h * dh:(h + 1) * dh] = att.astype(o_ref.dtype)


def pallas_multi_head_attention(q, k, v, mask, n_heads, *, tq=ATTN_TQ, tk=ATTN_TK):
    """q: (B, Nq, D), k/v: (B, Nk, D) bf16; mask: (1, Nq, Nk) f32 -> (B, Nq, D) bf16."""
    B, Nq, D = q.shape
    Nk = k.shape[1]
    dh = D // n_heads

    tq = min(tq, Nq)                       # edge q-blocks are safe (rows independent)
    tk = min(tk, Nk)
    if Nk % tk != 0:                       # keep padded keys out of the softmax
        tk = Nk
    n_q = pl.cdiv(Nq, tq)
    n_kv = Nk // tk

    return pl.pallas_call(
        functools.partial(_mha_kernel, n_heads=n_heads),
        out_shape=jax.ShapeDtypeStruct((B, Nq, D), q.dtype),
        grid=(B, n_q, n_kv),
        in_specs=[
            pl.BlockSpec((1, tq, D), lambda b, qi, kv: (b, qi, 0)),
            pl.BlockSpec((1, tk, D), lambda b, qi, kv: (b, kv, 0)),
            pl.BlockSpec((1, tk, D), lambda b, qi, kv: (b, kv, 0)),
            pl.BlockSpec((1, tq, tk), lambda b, qi, kv: (0, qi, kv)),
        ],
        out_specs=pl.BlockSpec((1, tq, D), lambda b, qi, kv: (b, qi, 0)),
        scratch_shapes=[
            pltpu.VMEM((n_heads, tq, 1), jnp.float32),    # running max
            pltpu.VMEM((n_heads, tq, 1), jnp.float32),    # running denom
            pltpu.VMEM((n_heads, tq, dh), jnp.float32),   # running numerator
        ],
        compiler_params=pltpu.CompilerParams(
            dimension_semantics=("parallel", "parallel", "arbitrary"),
            vmem_limit_bytes=VMEM_LIMIT_BYTES,
        ),
    )(q, k, v, mask)


# ---------------------------------------------------------------------------
# Full MultiHeadedAttentionFast forward
# ---------------------------------------------------------------------------
def multi_headed_attention_fast(x, keys, values, mask, params, n_heads):
    """x: (B, Nq, D); keys/values: (B, Nk, D) bf16; mask: (1, Nq, Nk) (1=keep, 0=mask)."""
    B, Nq, D = x.shape
    Nk = keys.shape[1]

    if mask is None:
        mask = jnp.ones((1, Nq, Nk), jnp.float32)
    mask = mask.astype(jnp.float32)

    if (keys is x) and (values is x):
        # self-attention: fused Q/K/V projection — one (M, D) x (D, 3D) matmul
        w_qkv = jnp.concatenate([params["wq"], params["wk"], params["wv"]], axis=1)
        b_qkv = jnp.concatenate([params["bq"], params["bk"], params["bv"]], axis=0)
        qkv = pallas_linear(x.reshape(-1, D), w_qkv, b_qkv).reshape(B, Nq, 3 * D)
        q = qkv[..., :D]
        k = qkv[..., D:2 * D]
        v = qkv[..., 2 * D:]
    else:
        # cross-attention: separate (tiled, pipelined) projections
        q = pallas_linear(x.reshape(-1, D), params["wq"], params["bq"]).reshape(B, Nq, D)
        k = pallas_linear(keys.reshape(-1, D), params["wk"], params["bk"]).reshape(B, Nk, D)
        v = pallas_linear(values.reshape(-1, D), params["wv"], params["bv"]).reshape(B, Nk, D)

    # attention stays in (B, N, D) layout: no head split/concat HBM transposes
    att = pallas_multi_head_attention(q, k, v, mask, n_heads)

    out = pallas_linear(att.reshape(-1, D), params["wo"], params["bo"]).reshape(B, Nq, D)
    # dropout: identity in eval mode
    return out


# ---------------------------------------------------------------------------
# Pure-JAX reference (same casting discipline) for a sanity check
# ---------------------------------------------------------------------------
def reference_forward(x, keys, values, mask, params, n_heads):
    def lin(t, w, b):
        return (
            jnp.dot(t.astype(jnp.float32), w.astype(jnp.float32))
            + b.astype(jnp.float32)
        ).astype(jnp.bfloat16)

    B, Nq, D = x.shape
    dh = D // n_heads
    q = lin(x, params["wq"], params["bq"])
    k = lin(keys, params["wk"], params["bk"])
    v = lin(values, params["wv"], params["bv"])
    outs = []
    for h in range(n_heads):
        qi = q[:, :, h * dh:(h + 1) * dh].astype(jnp.float32)
        ki = k[:, :, h * dh:(h + 1) * dh].astype(jnp.float32)
        vi = v[:, :, h * dh:(h + 1) * dh].astype(jnp.float32)
        s = jnp.einsum("bqd,bkd->bqk", qi, ki) / jnp.sqrt(jnp.float32(dh))
        s = jnp.where(mask == 0, -10000.0, s)
        p = jax.nn.softmax(s, axis=-1)
        outs.append(jnp.einsum("bqk,bkd->bqd", p, vi).astype(jnp.bfloat16))
    att = jnp.concatenate(outs, axis=-1)
    return lin(att, params["wo"], params["bo"])


if __name__ == "__main__":
    # Small shapes consistent with the module: B=2, seq=8, dim_input=32, n_heads=4
    B, N, D, H = 2, 8, 32, 4
    key = jax.random.PRNGKey(0)
    ks = jax.random.split(key, 11)

    scale = 1.0 / jnp.sqrt(jnp.float32(D))
    params = {
        "wq": (jax.random.normal(ks[0], (D, D), jnp.float32) * scale).astype(jnp.bfloat16),
        "bq": (jax.random.normal(ks[1], (D,), jnp.float32) * scale).astype(jnp.bfloat16),
        "wk": (jax.random.normal(ks[2], (D, D), jnp.float32) * scale).astype(jnp.bfloat16),
        "bk": (jax.random.normal(ks[3], (D,), jnp.float32) * scale).astype(jnp.bfloat16),
        "wv": (jax.random.normal(ks[4], (D, D), jnp.float32) * scale).astype(jnp.bfloat16),
        "bv": (jax.random.normal(ks[5], (D,), jnp.float32) * scale).astype(jnp.bfloat16),
        "wo": (jax.random.normal(ks[6], (D, D), jnp.float32) * scale).astype(jnp.bfloat16),
        "bo": (jax.random.normal(ks[7], (D,), jnp.float32) * scale).astype(jnp.bfloat16),
    }

    x = jax.random.normal(ks[8], (B, N, D), jnp.float32).astype(jnp.bfloat16)
    kv_k = jax.random.normal(ks[9], (B, N, D), jnp.float32).astype(jnp.bfloat16)
    kv_v = jax.random.normal(ks[10], (B, N, D), jnp.float32).astype(jnp.bfloat16)
    # causal mask, shape (1, Nq, Nk); 1 = attend, 0 = masked (== False in torch)
    mask = jnp.tril(jnp.ones((N, N), jnp.float32))[None, :, :]

    # --- self-attention path (fused QKV projection) ---
    out_self = multi_headed_attention_fast(x, x, x, mask, params, n_heads=H)
    out_self = jax.block_until_ready(out_self)
    ref_self = reference_forward(x, x, x, mask, params, H)
    assert out_self.shape == (B, N, D) and out_self.dtype == jnp.bfloat16
    assert jnp.allclose(out_self.astype(jnp.float32), ref_self.astype(jnp.float32),
                        atol=1e-1, rtol=1e-1)

    # --- cross-attention path (separate projections) ---
    out_cross = multi_headed_attention_fast(x, kv_k, kv_v, mask, params, n_heads=H)
    out_cross = jax.block_until_ready(out_cross)
    ref_cross = reference_forward(x, kv_k, kv_v, mask, params, H)
    assert out_cross.shape == (B, N, D) and out_cross.dtype == jnp.bfloat16
    assert jnp.allclose(out_cross.astype(jnp.float32), ref_cross.astype(jnp.float32),
                        atol=1e-1, rtol=1e-1)

    print("KERNEL_OK")
</pallas_src>

<mosaic_0001>
module attributes {stable_mosaic.version = 11 : i64} {
  func.func @_linear_kernel(%arg0: i32, %arg1: memref<16x32xbf16, #tpu.memory_space<vmem>>, %arg2: memref<32x96xbf16, #tpu.memory_space<vmem>>, %arg3: memref<1x96xbf16, #tpu.memory_space<vmem>>, %arg4: memref<16x96xbf16, #tpu.memory_space<vmem>>) attributes {dimension_semantics = [#tpu.dimension_semantics<parallel>], iteration_bounds = array<i64: 1>, scalar_prefetch = 0 : i64, scratch_operands = 0 : i64, tpu.core_type = #tpu.core_type<tc>, window_params = [{transform_indices = @transform_0, window_bounds = array<i64: 16, 32>}, {pipeline_mode = #tpu.pipeline_mode<synchronous>, transform_indices = @transform_1, window_bounds = array<i64: 32, 96>}, {pipeline_mode = #tpu.pipeline_mode<synchronous>, transform_indices = @transform_2, window_bounds = array<i64: 1, 96>}, {transform_indices = @transform_3, window_bounds = array<i64: 16, 96>}]} {
    %c0 = arith.constant 0 : index
    %c0_0 = arith.constant 0 : index
    %0 = vector.load %arg1[%c0, %c0_0] : memref<16x32xbf16, #tpu.memory_space<vmem>>, vector<16x32xbf16>
    %c0_1 = arith.constant 0 : index
    %c0_2 = arith.constant 0 : index
    %1 = vector.load %arg2[%c0_1, %c0_2] : memref<32x96xbf16, #tpu.memory_space<vmem>>, vector<32x96xbf16>
    %cst = arith.constant dense<0.000000e+00> : vector<16x96xf32>
    %2 = tpu.matmul %0, %1, %cst {dimension_numbers = #tpu.dot_dimension_numbers<[1], [0], [0], [1], [0, 0, 1, 1], [], []>} : vector<16x32xbf16>, vector<32x96xbf16>, vector<16x96xf32> -> vector<16x96xf32>
    %c0_3 = arith.constant 0 : index
    %c0_4 = arith.constant 0 : index
    %3 = vector.load %arg3[%c0_3, %c0_4] : memref<1x96xbf16, #tpu.memory_space<vmem>>, vector<1x96xbf16>
    %4 = arith.extf %3 : vector<1x96xbf16> to vector<1x96xf32>
    %5 = vector.broadcast %4 : vector<1x96xf32> to vector<16x96xf32>
    %6 = arith.addf %2, %5 : vector<16x96xf32>
    %7 = arith.truncf %6 : vector<16x96xf32> to vector<16x96xbf16>
    %c0_5 = arith.constant 0 : index
    %c0_6 = arith.constant 0 : index
    %8 = vector.load %arg4[%c0_5, %c0_6] : memref<16x96xbf16, #tpu.memory_space<vmem>>, vector<16x96xbf16>
    tpu.vector_store %arg4[%c0_5, %c0_6], %7 {strides = array<i32>} : memref<16x96xbf16, #tpu.memory_space<vmem>>, vector<16x96xbf16>,
    return
  }
  func.func @transform_0(%arg0: i32) -> (i32, i32) {
    %c0_i32 = arith.constant 0 : i32
    %c0_i32_0 = arith.constant 0 : i32
    return %arg0, %c0_i32 : i32, i32
  }
  func.func @transform_1(%arg0: i32) -> (i32, i32) {
    %c0_i32 = arith.constant 0 : i32
    %c0_i32_0 = arith.constant 0 : i32
    %c0_i32_1 = arith.constant 0 : i32
    return %c0_i32, %c0_i32_0 : i32, i32
  }
  func.func @transform_2(%arg0: i32) -> (i32, i32) {
    %c0_i32 = arith.constant 0 : i32
    %c0_i32_0 = arith.constant 0 : i32
    %c0_i32_1 = arith.constant 0 : i32
    return %c0_i32, %c0_i32_0 : i32, i32
  }
  func.func @transform_3(%arg0: i32) -> (i32, i32) {
    %c0_i32 = arith.constant 0 : i32
    %c0_i32_0 = arith.constant 0 : i32
    return %arg0, %c0_i32 : i32, i32
  }
}

</mosaic_0001>

<bundles_post_ra>
// kernel: tpu_custom_call.1
= control target key start
LH: loop header
LB: loop body
LE: loop exit
PB: predicated region body
PF: predicated region fallthrough
CT: control target
= control target key end

     0   :  { %8 = vsyncpa [#allocation3], 0  ;;  %s323_s0 = inlined_call_operand.hbm [shape: bf16[16,32], index: 0, kind: input, shape index: {}]   ;;  %s324_s1 = inlined_call_operand.hbm [shape: bf16[32,96], index: 1, kind: input, shape index: {}]   ;;  %s325_s2 = inlined_call_operand.vmem [shape: bf16[1,96], index: 2, kind: input, shape index: {}]   ;;  %s326_s3 = inlined_call_operand.hbm [shape: bf16[16,96], index: 3, kind: output, shape index: {}]  }
   0x1   :  { %9 = vsyncpa [#allocation6], 0 }
   0x2   :  { %10 = vsyncpa [#allocation4], 0  ;;  %s248_s12 = smov [#allocation2]   ;;  %s176_s16 = scalar_lea.hbm %s323_s0, 128 }
   0x3   :  { %s16_s13 = sshll.u32 %s248_s12, 4  ;;  %p177_p0 = scmp.ne.s32.totalorder %s323_s0, %s176_s16  ;;  %s17_s13 = int_to_ptr.vmem [resolvable:$true] %s16_s13 }
   0x4   :  { %p180_p1 = scmp.lt.u32.totalorder %s176_s16, %s323_s0 }
   0x6   :  { %p182_p2 = pnand %p180_p1, %p177_p0 }
   0x8   :  { %185 = shalt.err (!%p182_p2)
}
   0x9   :  { %s186_s21 = scalar_lea.vmem %s17_s13, 128  ;;  %p191_p4 = scmp.lt.s32.totalorder %s17_s13, %s17_s13 }
   0xa   :  { %p187_p3 = scmp.ne.s32.totalorder %s17_s13, %s186_s21  ;;  %p192_p5 = scmp.lt.s32.totalorder %s186_s21, %s186_s21 }
   0xc   :  { %p193_p6 = por %p192_p5, %p191_p4 }
   0xe   :  { %p194_p7 = pnand %p193_p6, %p187_p3 }
  0x10   :  { %197 = shalt.err (!%p194_p7)
}
  0x11   :  { %s249_s22 = smov 64   ;;  %s250_s23 = smov 4  }
  0x12   :  { %22 = dma.hbm_to_vmem [thread:$0]  %s323_s0, 128, %s17_s13, [#allocation3], %s249_s22, %s249_s22, %s250_s23  }
  0x13   :  { %s251_s26 = smov [#allocation5]   ;;  %s198_s30 = scalar_lea.hbm %s324_s1, 256 }
  0x14   :  { %s28_s27 = sshll.u32 %s251_s26, 4  ;;  %p199_p8 = scmp.ne.s32.totalorder %s324_s1, %s198_s30  ;;  %s29_s27 = int_to_ptr.vmem [resolvable:$true] %s28_s27 }
  0x15   :  { %p202_p9 = scmp.lt.u32.totalorder %s198_s30, %s324_s1 }
  0x17   :  { %p204_p10 = pnand %p202_p9, %p199_p8 }
  0x19   :  { %207 = shalt.err (!%p204_p10)
}
  0x1a   :  { %s208_s8 = scalar_lea.vmem %s29_s27, 256  ;;  %p213_p12 = scmp.lt.s32.totalorder %s29_s27, %s29_s27 }
  0x1b   :  { %p209_p11 = scmp.ne.s32.totalorder %s29_s27, %s208_s8  ;;  %p214_p13 = scmp.lt.s32.totalorder %s208_s8, %s208_s8 }
  0x1d   :  { %p215_p0 = por %p214_p13, %p213_p12 }
  0x1f   :  { %p216_p1 = pnand %p215_p0, %p209_p11 }
  0x21   :  { %219 = shalt.err (!%p216_p1)
}
  0x22   :  { %34 = dma.hbm_to_vmem [thread:$0]  %s324_s1, 256, %s29_s27, [#allocation6], %s249_s22, %s249_s22, %s250_s23  }
  0x23   :  { %242 = dma.done.wait [#allocation3], 128  }
  0x24   :  { %243 = vsyncadd [#allocation3], 4294967168 }
  0x25   :  { %244 = dma.done.wait [#allocation6], 256  }
  0x26   :  { %245 = vsyncadd [#allocation6], 4294967040  ;;  %v252_v0 = vmov 0.0   ;;  %vm253_vm0 = vmmov 0   ;;  %v173_v1 = vld [vmem:[#allocation5] sm:$0xff]   ;;  %v174_v2 = vld [vmem:[#allocation5 + $0x8] sm:$0xff]   ;;  %v52_v4 = vlaneseq }
  0x27   :  { %158 = vmatprep.subr.bf16.mxu0 %v252_v0  ;;  %162 = vmatprep.mubr.msk.bf16.mxu0 %vm253_vm0, %v252_v0  ;;  %v175_v3 = vld [vmem:[#allocation2] sm:$0xff]   ;;  %vm73_vm1 = vcmask 261120   ;;  %vm126_vm2 = vcmask 781312   ;;  %s254_s11 = smov [#allocation7]  }
  0x28   :  { %159 = vmatpush3.bf16.msra.mxu0 %v173_v1  ;;  %v53_v5 = vshrl.u32 %v52_v4, 7  ;;  %v50_v6 = vld [vmem:[%s325_s2] sm:$0x1]  ;;  %s134_s12 = sshll.u32 %s254_s11, 4  ;;  %s135_s12 = int_to_ptr.vmem [resolvable:$true] %s134_s12 }
  0x29   :  { %160 = vmatprep.subr.bf16.mxu0 %v252_v0  ;;  %v51_v7 = vunpack.c.l.bf16 %v50_v6  ;;  %s220_s13 = scalar_lea.vmem %s135_s12, 128  ;;  %p225_p3 = scmp.lt.s32.totalorder %s135_s12, %s135_s12 }
  0x2a   :  { %v54_v8 = vsub.s32 0, %v53_v5  ;;  %p221_p2 = scmp.ne.s32.totalorder %s135_s12, %s220_s13  ;;  %p226_p4 = scmp.lt.s32.totalorder %s220_s13, %s220_s13 }
  0x2c   :  { %161 = vmatpush3.bf16.msra.mxu0 %v174_v2  ;;  %v55_v9 = vrot.slane %v51_v7, %v54_v8  ;;  %p227_p5 = por %p226_p4, %p225_p3 }
  0x2e   :  { %p228_p6 = pnand %p227_p5, %p221_p2 }
  0x2f   :  { %163 = vmatmul.mubr.msk.bf16.vlgmr.msra.gmra.mrb[0].mxu0 %vm73_vm1, %v175_v3 }
 0x102   :  { %v111_v10 = vpop.f32.mrb[0].mxu0 }
 0x103   :  { %v112_v11 = vadd.f32 %v111_v10, %v55_v9  ;;  %v164_v12 = vpop.f32.mrb[1].mxu0 }
 0x104   :  { %v114_v13 = vpop.f32.mrb[2].mxu0 }
 0x105   :  { %v153_v14 = vpack.c.bf16 %v112_v11, %v112_v11  ;;  %v115_v15 = vadd.f32 %v114_v13, %v55_v9  ;;  %v165_v16 = vpop.f32.mrb[3].mxu0 }
 0x107   :  { %v154_v17 = vpack.c.bf16 %v115_v15, %v115_v15  ;;  %127 = vst.msk [vmem:[#allocation7] sm:$0xf] %vm126_vm2, %v153_v14 }
 0x109   :  { %128 = vst.msk [vmem:[#allocation7 + $0x4] sm:$0xf] %vm126_vm2, %v154_v17 }
 0x10a   :  { %231 = shalt.err (!%p228_p6)
}
 0x10b   :  { %s232_s15 = scalar_lea.hbm %s326_s3, 128 }
 0x10c   :  { %p233_p7 = scmp.ne.s32.totalorder %s326_s3, %s232_s15  ;;  %p236_p8 = scmp.lt.u32.totalorder %s232_s15, %s326_s3 }
 0x10e   :  { %p238_p9 = pnand %p236_p8, %p233_p7 }
 0x110   :  { %241 = shalt.err (!%p238_p9)
}
 0x111   :  { %140 = dma.vmem_to_hbm [thread:$0]  %s135_s12, 128, %s326_s3, [#allocation4], %s249_s22, %s249_s22, %s250_s23  }
 0x112   :  { %246 = dma.done.wait [#allocation4], 128  }
 0x113   :  { %247 = vsyncadd [#allocation4], 4294967168 }
 0x114   :  { %144 = vsyncpa [#allocation3], 1 }
 0x115   :  { %145 = vsyncpa [#allocation6], 1 }
 0x116   :  { %146 = vsyncpa [#allocation4], 1 }

</bundles_post_ra>
